<compile_context>
chip_gen: v7x
topology: tpu7x:2x2x1
jax: 0.10.0
libtpu: 0.0.40
codegen_flags: <defaults>
</compile_context>

<pallas_src>
import jax
import jax.numpy as jnp
from jax.experimental import pallas as pl
from jax.experimental.pallas import tpu as pltpu

BN_EPS = 1e-5
NEG_SLOPE = 0.1


def _round_up(v, m):
    return (v + m - 1) // m * m


def _net_kernel(x_ref, w1_ref, b1_ref, w2_ref, b2_ref, o_ref):
    # Dropout(0.05) in eval mode is identity.
    # Layer 1: x @ W1' + b1'  (BatchNorm folded into W1'/b1').  x arrives f32
    # and is cast to the MXU dtype here (no extra wrapper-side HBM pass).
    x = x_ref[...].astype(w1_ref.dtype)
    h = jnp.dot(x, w1_ref[...], preferred_element_type=jnp.float32)
    # Epilogue in epilogue_dtype (carried by b1's dtype): bias + LeakyReLU.
    h = h.astype(b1_ref.dtype) + b1_ref[...]
    # LeakyReLU(negative_slope=0.1): single max (exact for 0 < slope < 1).
    h = jnp.maximum(h, NEG_SLOPE * h)

    # Dropout eval identity, then Layer 2 on the MXU: W2 is zero-padded to 128
    # output lanes; only the first d_out columns of the result are valid.
    res = jnp.dot(h, w2_ref[...], preferred_element_type=jnp.float32)
    d_out = o_ref.shape[-1]
    o_ref[...] = (res[:, :d_out] + b2_ref[...]).astype(o_ref.dtype)


def net_forward(x, params, *, tile_m=2048, mxu_dtype=jnp.bfloat16,
                epilogue_dtype=jnp.float32):
    """Fused MLP forward.  x: (N, D_in) float32 -> (N, d_out) float32.

    epilogue_dtype=jnp.bfloat16 is recommended on v6e/v7x (bf16 VPU); keep the
    default float32 on v5e (no bf16 VALU).
    """
    n, d_in = x.shape
    w1, b1, gamma, beta, rmean, rvar, w2, b2 = params
    h_dim = w1.shape[1]
    d_out = w2.shape[1]
    assert d_out <= 128, "head wider than 128 lanes would need output tiling"

    # ---- Fold eval-mode BatchNorm into the first linear layer (constants). ----
    scale = gamma * jax.lax.rsqrt(rvar + BN_EPS)                  # (1, H)
    w1_f = (w1 * scale).astype(mxu_dtype)                         # (D_in, H)
    b1_f = ((b1 - rmean) * scale + beta).astype(epilogue_dtype)   # (1, H)
    # Zero-pad W2 to a full 128-lane tile so layer 2 runs on the idle MXU.
    w2_pad = jnp.zeros((h_dim, 128), epilogue_dtype)
    w2_pad = w2_pad.at[:, :d_out].set(w2.astype(epilogue_dtype))
    b2_f = b2.astype(jnp.float32)                                 # (1, d_out)

    # ---- Batch tiling. ----
    # Large tiles amortize per-grid-step overhead; cap tile_m so the grid has
    # at least 2 tiles (v7x shards the "parallel" batch axis over its 2 TCs).
    if n <= 16:
        tile_m = n                       # single full block (block == array dims)
    else:
        tile_m = max(8, min(tile_m, _round_up(pl.cdiv(n, 2), 8)))
    num_tiles = pl.cdiv(n, tile_m)
    n_pad = num_tiles * tile_m
    # x reads in the last (ragged) block are masked by Pallas; the output is
    # allocated at the padded size so all writes are in-bounds, then sliced.

    full = lambda i: (0, 0)  # noqa: E731

    out = pl.pallas_call(
        _net_kernel,
        out_shape=jax.ShapeDtypeStruct((n_pad, d_out), jnp.float32),
        grid_spec=pltpu.PrefetchScalarGridSpec(
            num_scalar_prefetch=0,
            grid=(num_tiles,),
            in_specs=[
                pl.BlockSpec((tile_m, d_in), lambda i: (i, 0)),  # x tile (f32)
                pl.BlockSpec((d_in, h_dim), full),               # W1 (BN folded)
                pl.BlockSpec((1, h_dim), full),                  # b1 (BN folded)
                pl.BlockSpec((h_dim, 128), full),                # W2 padded to 128 lanes
                pl.BlockSpec((1, d_out), full),                  # b2
            ],
            out_specs=pl.BlockSpec((tile_m, d_out), lambda i: (i, 0)),
        ),
        compiler_params=pltpu.CompilerParams(
            dimension_semantics=("parallel",),
            # Explicit VMEM budget: x tiles + resident weights + lane-padded
            # output buffers + the (tile_m, H) h value stay far below this on
            # all generations (incl. v7x's 64 MiB physical VMEM).
            vmem_limit_bytes=32 * 1024 * 1024,
        ),
    )(x, w1_f, b1_f, w2_pad, b2_f)
    return out[:n]


def init_params(key, input_dim, hidden, output_dim):
    """Deterministic init mirroring Net.__init__ / _weight_init."""
    k1, k2, k3, k4 = jax.random.split(key, 4)

    # kaiming_normal_(a=0.1, mode='fan_in', nonlinearity='leaky_relu'):
    # std = sqrt(2 / (1 + a^2)) / sqrt(fan_in)
    gain = (2.0 / (1.0 + NEG_SLOPE ** 2)) ** 0.5

    std1 = gain / (input_dim ** 0.5)
    w1 = std1 * jax.random.normal(k1, (input_dim, hidden), jnp.float32)
    bound1 = 1.0 / (input_dim ** 0.5)
    b1 = jax.random.uniform(k2, (1, hidden), jnp.float32, -bound1, bound1)

    # BatchNorm1d defaults: gamma=1, beta=0, running_mean=0, running_var=1
    gamma = jnp.ones((1, hidden), jnp.float32)
    beta = jnp.zeros((1, hidden), jnp.float32)
    rmean = jnp.zeros((1, hidden), jnp.float32)
    rvar = jnp.ones((1, hidden), jnp.float32)

    std2 = gain / (hidden ** 0.5)
    w2 = std2 * jax.random.normal(k3, (hidden, output_dim), jnp.float32)
    bound2 = 1.0 / (hidden ** 0.5)
    b2 = jax.random.uniform(k4, (1, output_dim), jnp.float32, -bound2, bound2)

    return (w1, b1, gamma, beta, rmean, rvar, w2, b2)


def reference_forward(x, params):
    """Pure-JAX reference (same eval-mode semantics, un-folded BN)."""
    w1, b1, gamma, beta, rmean, rvar, w2, b2 = params
    h = x @ w1 + b1
    h = (h - rmean) * jax.lax.rsqrt(rvar + BN_EPS) * gamma + beta
    h = jnp.where(h >= 0, h, NEG_SLOPE * h)
    return h @ w2 + b2


if __name__ == "__main__":
    INPUT_DIM = 32
    HIDDEN = 256
    OUTPUT_DIM = 1
    BATCH = 20   # not a multiple of 8 -> exercises the ragged last tile

    key = jax.random.PRNGKey(0)
    kx, kp = jax.random.split(key)

    x = jax.random.normal(kx, (BATCH, INPUT_DIM), jnp.float32)
    params = init_params(kp, INPUT_DIM, HIDDEN, OUTPUT_DIM)
    ref = reference_forward(x, params)

    # Full-f32 path: tight tolerance vs reference.
    out_f32 = jax.block_until_ready(
        net_forward(x, params, mxu_dtype=jnp.float32, epilogue_dtype=jnp.float32))
    assert out_f32.shape == (BATCH, OUTPUT_DIM)
    assert jnp.allclose(out_f32, ref, atol=1e-3, rtol=1e-3), "f32 mismatch vs reference"

    # Default path (bf16 MXU weights/inputs, f32 epilogue): looser tolerance.
    out_bf16 = jax.block_until_ready(net_forward(x, params))
    assert out_bf16.shape == (BATCH, OUTPUT_DIM)
    assert jnp.allclose(out_bf16, ref, atol=5e-2, rtol=5e-2), "bf16 mismatch vs reference"

    # v6e/v7x-style bf16 epilogue (bias/LeakyReLU/layer-2 operand in bf16).
    out_bf16_epi = jax.block_until_ready(
        net_forward(x, params, epilogue_dtype=jnp.bfloat16))
    assert out_bf16_epi.shape == (BATCH, OUTPUT_DIM)
    assert jnp.allclose(out_bf16_epi, ref, atol=1e-1, rtol=1e-1), \
        "bf16-epilogue mismatch vs reference"

    print("KERNEL_OK")
</pallas_src>

<mosaic_0001>
module attributes {stable_mosaic.version = 11 : i64} {
  func.func @_net_kernel(%arg0: i32, %arg1: memref<16x32xf32, #tpu.memory_space<vmem>>, %arg2: memref<32x256xf32, #tpu.memory_space<vmem>>, %arg3: memref<1x256xf32, #tpu.memory_space<vmem>>, %arg4: memref<256x128xf32, #tpu.memory_space<vmem>>, %arg5: memref<1x1xf32, #tpu.memory_space<vmem>>, %arg6: memref<16x1xf32, #tpu.memory_space<vmem>>) attributes {dimension_semantics = [#tpu.dimension_semantics<parallel>], iteration_bounds = array<i64: 2>, scalar_prefetch = 0 : i64, scratch_operands = 0 : i64, tpu.core_type = #tpu.core_type<tc>, window_params = [{transform_indices = @transform_0, window_bounds = array<i64: 16, 32>}, {pipeline_mode = #tpu.pipeline_mode<synchronous>, transform_indices = @transform_1, window_bounds = array<i64: 32, 256>}, {pipeline_mode = #tpu.pipeline_mode<synchronous>, transform_indices = @transform_2, window_bounds = array<i64: 1, 256>}, {pipeline_mode = #tpu.pipeline_mode<synchronous>, transform_indices = @transform_3, window_bounds = array<i64: 256, 128>}, {pipeline_mode = #tpu.pipeline_mode<synchronous>, transform_indices = @transform_4, window_bounds = array<i64: 1, 1>}, {transform_indices = @transform_5, window_bounds = array<i64: 16, 1>}]} {
    %c0 = arith.constant 0 : index
    %c0_0 = arith.constant 0 : index
    %0 = vector.load %arg1[%c0, %c0_0] : memref<16x32xf32, #tpu.memory_space<vmem>>, vector<16x32xf32>
    %c0_1 = arith.constant 0 : index
    %c0_2 = arith.constant 0 : index
    %1 = vector.load %arg2[%c0_1, %c0_2] : memref<32x256xf32, #tpu.memory_space<vmem>>, vector<32x256xf32>
    %cst = arith.constant dense<0.000000e+00> : vector<16x256xf32>
    %2 = tpu.matmul %0, %1, %cst {dimension_numbers = #tpu.dot_dimension_numbers<[1], [0], [0], [1], [0, 0, 1, 1], [], []>} : vector<16x32xf32>, vector<32x256xf32>, vector<16x256xf32> -> vector<16x256xf32>
    %c0_3 = arith.constant 0 : index
    %c0_4 = arith.constant 0 : index
    %3 = vector.load %arg3[%c0_3, %c0_4] : memref<1x256xf32, #tpu.memory_space<vmem>>, vector<1x256xf32>
    %4 = vector.broadcast %3 : vector<1x256xf32> to vector<16x256xf32>
    %5 = arith.addf %2, %4 : vector<16x256xf32>
    %cst_5 = arith.constant 1.000000e-01 : f32
    %6 = vector.broadcast %cst_5 : f32 to vector<16x256xf32>
    %7 = arith.mulf %6, %5 : vector<16x256xf32>
    %8 = arith.maximumf %5, %7 : vector<16x256xf32>
    %c0_6 = arith.constant 0 : index
    %c0_7 = arith.constant 0 : index
    %9 = vector.load %arg4[%c0_6, %c0_7] : memref<256x128xf32, #tpu.memory_space<vmem>>, vector<256x128xf32>
    %cst_8 = arith.constant dense<0.000000e+00> : vector<16x128xf32>
    %10 = tpu.matmul %8, %9, %cst_8 {dimension_numbers = #tpu.dot_dimension_numbers<[1], [0], [0], [1], [0, 0, 1, 1], [], []>} : vector<16x256xf32>, vector<256x128xf32>, vector<16x128xf32> -> vector<16x128xf32>
    %11 = vector.extract_strided_slice %10 {offsets = [0, 0], sizes = [16, 1], strides = [1, 1]} : vector<16x128xf32> to vector<16x1xf32>
    %c0_9 = arith.constant 0 : index
    %c0_10 = arith.constant 0 : index
    %12 = vector.load %arg5[%c0_9, %c0_10] : memref<1x1xf32, #tpu.memory_space<vmem>>, vector<1x1xf32>
    %13 = vector.broadcast %12 : vector<1x1xf32> to vector<16x1xf32>
    %14 = arith.addf %11, %13 : vector<16x1xf32>
    %c0_11 = arith.constant 0 : index
    %c0_12 = arith.constant 0 : index
    %15 = vector.load %arg6[%c0_11, %c0_12] : memref<16x1xf32, #tpu.memory_space<vmem>>, vector<16x1xf32>
    tpu.vector_store %arg6[%c0_11, %c0_12], %14 {strides = array<i32>} : memref<16x1xf32, #tpu.memory_space<vmem>>, vector<16x1xf32>,
    return
  }
  func.func @transform_0(%arg0: i32) -> (i32, i32) {
    %c0_i32 = arith.constant 0 : i32
    %c0_i32_0 = arith.constant 0 : i32
    return %arg0, %c0_i32 : i32, i32
  }
  func.func @transform_1(%arg0: i32) -> (i32, i32) {
    %c0_i32 = arith.constant 0 : i32
    %c0_i32_0 = arith.constant 0 : i32
    %c0_i32_1 = arith.constant 0 : i32
    return %c0_i32, %c0_i32_0 : i32, i32
  }
  func.func @transform_2(%arg0: i32) -> (i32, i32) {
    %c0_i32 = arith.constant 0 : i32
    %c0_i32_0 = arith.constant 0 : i32
    %c0_i32_1 = arith.constant 0 : i32
    return %c0_i32, %c0_i32_0 : i32, i32
  }
  func.func @transform_3(%arg0: i32) -> (i32, i32) {
    %c0_i32 = arith.constant 0 : i32
    %c0_i32_0 = arith.constant 0 : i32
    %c0_i32_1 = arith.constant 0 : i32
    return %c0_i32, %c0_i32_0 : i32, i32
  }
  func.func @transform_4(%arg0: i32) -> (i32, i32) {
    %c0_i32 = arith.constant 0 : i32
    %c0_i32_0 = arith.constant 0 : i32
    %c0_i32_1 = arith.constant 0 : i32
    return %c0_i32, %c0_i32_0 : i32, i32
  }
  func.func @transform_5(%arg0: i32) -> (i32, i32) {
    %c0_i32 = arith.constant 0 : i32
    %c0_i32_0 = arith.constant 0 : i32
    return %arg0, %c0_i32 : i32, i32
  }
}

</mosaic_0001>

<bundles_post_ra>
// kernel: tpu_custom_call.1
= control target key start
LH: loop header
LB: loop body
LE: loop exit
PB: predicated region body
PF: predicated region fallthrough
CT: control target
= control target key end

     0   :  { %s1135_s0 = inlined_call_operand.hbm [shape: f32[20,32], index: 0, kind: input, shape index: {}]   ;;  %s1136_s1 = inlined_call_operand.hbm [shape: f32[32,256], index: 1, kind: input, shape index: {}]   ;;  %s1137_s2 = inlined_call_operand.vmem [shape: f32[1,256], index: 2, kind: input, shape index: {}]   ;;  %s1138_s3 = inlined_call_operand.hbm [shape: f32[256,128], index: 3, kind: input, shape index: {}]   ;;  %s1139_s4 = inlined_call_operand.<no memory space> [shape: f32[1,1], index: 4, kind: input, shape index: {}]   ;;  %s1140_s5 = inlined_call_operand.vmem [shape: f32[32,1], index: 5, kind: output, shape index: {}]  }
   0x1   :  { %v10_v0 = vstv %s1139_s4 }
   0x2   :  { %11 = vst [vmem:[#allocation2] sm:$0x1] %v10_v0 }
   0x3   :  { %12 = vsyncpa [#allocation4], 0 }
   0x4   :  { %14 = vsyncpa [#allocation4 + $0x1], 0 }
   0x5   :  { %15 = vsyncpa [#allocation6], 0  ;;  %s938_s20 = smov 0   ;;  %s940_s21 = smov 0  }
   0x6   :  { %s942_s22 = smov 0   ;;  %s944_s23 = smov 0  }
   0x7 LB: > { %s607_s4 = sadd.s32 4294967295, %s893_s23   ;;  %s958_s24 = sadd.s32 1, %s893_s23   ;;  %s893_s23 = sphi %s944_s23, %s1157_s23   ;;  %s889_s22 = sphi %s942_s22, %s1156_s22   ;;  %s885_s21 = sphi %s940_s21, %s1155_s21   ;;  %s881_s20 = sphi %s938_s20, %s1154_s20  }
   0x8   : > { %s25_s25 = ssub.s32 %s893_s23, %s958_s24  ;;  %s28_s26 = sadd.s32 1, %s889_s22 }
   0x9   : > { %p26_p0 = scmp.eq.s32.totalorder %s25_s25, 0  ;;  %p35_p1 = scmp.ne.s32.totalorder %s889_s22, %s885_s21 }
   0xa   : > { %p36_p2 = scmp.eq.s32.totalorder %s893_s23, 0  ;;  %p41_p3 = scmp.ne.s32.totalorder %s885_s21, %s881_s20 }
   0xb   : > { %s968_s27 = scalar_select %p26_p0, %s889_s22, %s28_s26  }
   0xc   : > { %p970_p4 = por %p36_p2, %p35_p1  ;;  %p976_p5 = scmp.eq.s32.totalorder %s607_s4, 0 }
   0xd   : > { %p609_p6 = scmp.ge.s32.totalorder %s893_s23, 1  ;;  %p162_p7 = scmp.lt.s32.totalorder %s893_s23, 3 }
   0xe   : > { %s1145_s28 = scalar_select %p970_p4, 1, 0 }
   0xf   : > { %s1146_s29 = scalar_select %p976_p5, 1, 0 }
  0x10   : > { %p984_p8 = por %p976_p5, %p41_p3  ;;  %p988_p9 = pnand %p609_p6, %p162_p7 }
  0x11   : > { %s895_s7 = smov [#allocation5]   ;;  %s896_s10 = smov [#allocation7]  }
  0x12   : > { %s1147_s30 = scalar_select %p984_p8, 1, 0 }
  0x13   : > { %s1148_s6 = scalar_select %p988_p9, 1, 0 }
  0x14   : > { %s174_s8 = sshll.u32 %s895_s7, 4  ;;  %p719_p10 = pneg %p988_p9  ;;  %s175_s8 = int_to_ptr.vmem [resolvable:$true] %s174_s8 }
  0x15   : > { %s190_s11 = sshll.u32 %s896_s10, 4  ;;  %s771_s14 = scalar_lea.hbm %s1136_s1, 1024  ;;  %s1000_s11 = int_to_ptr.vmem [resolvable:$true] %s190_s11 }
  0x16   : > { %p996_p11 = pnand %p719_p10, %p976_p5  ;;  %p772_p12 = scmp.ne.s32.totalorder %s1136_s1, %s771_s14 }
  0x17   : > { %p778_p2 = scmp.lt.u32.totalorder %s771_s14, %s1136_s1 }
  0x18   : > { %p773_p13 = pneg %p996_p11 }
  0x1a   : > { %p774_p0 = pnand %p773_p13, %p772_p12 }
  0x1c   : > { %p775_p1 = pneg %p774_p0 }
  0x1e   : > { %p780_p3 = pnand %p778_p2, %p775_p1 }
  0x20   : > { %783 = shalt.err (!%p780_p3)
}
  0x21   : > { %s784_s19 = scalar_lea.vmem %s175_s8, 1024  ;;  %p792_p5 = scmp.lt.s32.totalorder %s175_s8, %s175_s8 }
  0x22   : > { %p785_p6 = scmp.ne.s32.totalorder %s175_s8, %s784_s19  ;;  %p793_p8 = scmp.lt.s32.totalorder %s784_s19, %s784_s19 }
  0x24   : > { %p787_p7 = pnand %p785_p6, %p773_p13  ;;  %p794_p9 = por %p793_p8, %p792_p5 }
  0x26   : > { %p788_p10 = pneg %p787_p7 }
  0x28   : > { %p795_p4 = pnand %p794_p9, %p788_p10 }
  0x2a   : > { %798 = shalt.err (!%p795_p4)
}
  0x2b   : > { %s897_s20 = smov 256   ;;  %s898_s25 = smov 16  }
  0x2c   : > { %722 = dma.hbm_to_vmem [thread:$0]  (!%p996_p11), %s1136_s1, 1024, %s175_s8, [#allocation6], %s897_s20, %s897_s20, %s898_s25  }
  0x2d   : > { %s799_s13 = scalar_lea.hbm %s1138_s3, 4096 }
  0x2e   : > { %p800_p12 = scmp.ne.s32.totalorder %s1138_s3, %s799_s13  ;;  %p806_p8 = scmp.lt.u32.totalorder %s799_s13, %s1138_s3 }
  0x30   : > { %p802_p4 = pnand %p800_p12, %p773_p13 }
  0x32   : > { %p803_p5 = pneg %p802_p4 }
  0x34   : > { %p808_p9 = pnand %p806_p8, %p803_p5 }
  0x36   : > { %811 = shalt.err (!%p808_p9)
}
  0x37   : > { %s812_s8 = scalar_lea.vmem %s1000_s11, 4096  ;;  %p820_p3 = scmp.lt.s32.totalorder %s1000_s11, %s1000_s11 }
  0x38   : > { %p813_p0 = scmp.ne.s32.totalorder %s1000_s11, %s812_s8  ;;  %p821_p6 = scmp.lt.s32.totalorder %s812_s8, %s812_s8 }
  0x3a   : > { %p815_p1 = pnand %p813_p0, %p773_p13  ;;  %p822_p7 = por %p821_p6, %p820_p3 }
  0x3c   : > { %p816_p2 = pneg %p815_p1 }
  0x3e   : > { %p823_p10 = pnand %p822_p7, %p816_p2 }
  0x40   : > { %826 = shalt.err (!%p823_p10)
}
  0x41   : > { %s899_s18 = smov 128   ;;  %s900_s19 = smov 8  }
  0x42   : > { %725 = dma.hbm_to_vmem [thread:$0]  (!%p996_p11), %s1138_s3, 4096, %s1000_s11, [#allocation6], %s899_s18, %s899_s18, %s900_s19  }
  0x43   : > { %p612_p12 = scmp.ge.s32.totalorder %s893_s23, 2 }
  0x44   : > { %p1150_p13 = scmp.ne.s32.totalorder (!%p612_p12), %s1145_s28, 0 }
  0x45   : > { %203 = sbr.rel (%p612_p12) target bundleno = 111 (0x6f), region = 32 }
  0x4c   : > { %206 = sbr.rel (!%p1150_p13) target bundleno = 111 (0x6f), region = 36  ;;  %s207_s26 = sand.u32 (%p1150_p13), 1, %s889_s22  }
  0x4d   : > { %s614_s7 = sshll.u32 (%p1150_p13), %s893_s23, 1  ;;  %s613_s10 = sshll.u32 (%p1150_p13), %s207_s26, 4 }
  0x4e   : > { %s213_s12 = ssub.s32 (%p1150_p13), 3, %s614_s7  ;;  %s1057_s14 = scalar_lea.sflag (%p1150_p13), [#allocation4], %s207_s26 }
  0x4f   : > { %p214_p4 = scmp.lt.s32.totalorder (%p1150_p13), %s213_s12, 2  ;;  %s211_s11 = scalar_lea.vmem (%p1150_p13), [#allocation3], %s613_s10 }
  0x53   : > { %s1159_s12 = smov (!%p214_p4, %s213_s12), 2 }
  0x54   : > { %s1054_s13 = sshll.u32 %s1159_s12, 7 }
  0x55   : > { %s218_s9 = ssub.s32 256, %s1054_s13 }
  0x56   : > { %219 = vsyncadd %s1057_s14, %s218_s9  ;;  %p616_p11 = scmp.ne.s32.totalorder %s1054_s13, 0  ;;  %s631_s28 = sshll.u32 %s893_s23, 8 }
  0x57   : > { %s1065_s17 = scalar_lea.hbm %s1135_s0, %s631_s28  ;;  %s224_s8 = sshll.u32 %s211_s11, 4  ;;  %s1067_s8 = int_to_ptr.vmem [resolvable:$true] %s224_s8 }
  0x58   : > { %s827_s18 = scalar_lea.hbm %s1065_s17, %s1054_s13  ;;  %s831_s25 = scalar_lea.hbm %s1135_s0, 384 }
  0x59   : > { %p828_p5 = scmp.ne.s32.totalorder %s1065_s17, %s827_s18  ;;  %p832_p0 = scmp.lt.u32.totalorder %s1065_s17, %s1135_s0 }
  0x5a   : > { %p833_p1 = scmp.lt.u32.totalorder %s831_s25, %s827_s18  ;;  %p835_p3 = scmp.lt.u32.totalorder %s827_s18, %s1065_s17 }
  0x5b   : > { %p829_p8 = pnand %p828_p5, %p616_p11 }
  0x5c   : > { %p834_p2 = por %p833_p1, %p832_p0 }
  0x5d   : > { %p830_p9 = pneg %p829_p8 }
  0x5e   : > { %p836_p6 = por %p835_p3, %p834_p2 }
  0x60   : > { %p837_p7 = pnand %p836_p6, %p830_p9 }
  0x62   : > { %840 = shalt.err (!%p837_p7)
}
  0x63   : > { %s841_s10 = scalar_lea.vmem %s1067_s8, %s1054_s13  ;;  %s901_s12 = smov [#allocation3]  }
  0x64   : > { %p842_p10 = scmp.ne.s32.totalorder %s1067_s8, %s841_s10  ;;  %s845_s9 = sshll.u32 %s901_s12, 4  ;;  %s846_s9 = int_to_ptr.vmem [resolvable:$false] %s845_s9 }
  0x65   : > { %s847_s11 = scalar_lea.vmem %s846_s9, 512  ;;  %p848_p4 = scmp.lt.s32.totalorder %s1067_s8, %s846_s9 }
  0x66   : > { %p843_p12 = pnand %p842_p10, %p616_p11  ;;  %p849_p5 = scmp.lt.s32.totalorder %s847_s11, %s841_s10 }
  0x68   : > { %p844_p13 = pneg %p843_p12  ;;  %p850_p8 = por %p849_p5, %p848_p4 }
  0x6a   : > { %p851_p0 = pnand %p850_p8, %p844_p13 }
  0x6c   : > { %854 = shalt.err (!%p851_p0)
}
  0x6d   : > { %s902_s28 = smov 128   ;;  %s903_s15 = smov 8  }
  0x6e   : > { %230 = dma.hbm_to_vmem [thread:$0]  (%p616_p11), %s1065_s17, %s1054_s13, %s1067_s8, %s1057_s14, %s902_s28, %s902_s28, %s903_s15  }
  0x6f PF: > { %p1151_p9 = scmp.ne.s32.totalorder %s1148_s6, 0 }
  0x70   : > { %s238_s16 = sand.u32 (!%p1151_p9), 1, %s885_s21   ;;  %p1152_p1 = scmp.ne.s32.totalorder (!%p1151_p9), %s1147_s30, 0 }
  0x71   : > { %236 = sbr.rel (%p1151_p9) target bundleno = 577 (0x241), region = 40  ;;  %s1097_s18 = sshll.u32 (!%p1151_p9), %s238_s16, 4 }
  0x72   : > { %s239_s19 = scalar_lea.sflag (!%p1151_p9), [#allocation4], %s238_s16  ;;  %s242_s20 = scalar_lea.vmem (!%p1151_p9), [#allocation3], %s1097_s18 }
  0x78   : > { %872 = dma.done.wait (%p1152_p1), %s239_s19, 256  }
  0x79   : > { %874 = vsyncadd (%p1152_p1), %s239_s19, 4294967040  ;;  %p1153_p11 = scmp.ne.s32.totalorder %s1146_s29, 0 }
  0x7b   : > { %876 = dma.done.wait (%p1153_p11), [#allocation6], 5120  }
  0x7c   : > { %878 = vsyncadd (%p1153_p11), [#allocation6], 4294962176  ;;  %v904_v1 = vmov 0.0   ;;  %v291_v2 = vld [vmem:[#allocation5 + $0x8] sm:$0xff]  ;;  %v293_v3 = vld [vmem:[#allocation5 + $0x18] sm:$0xff]  ;;  %vm310_vm0 = vcmask 261120   ;;  %v300_v0 = vlaneseq }
  0x7d   : > { %381 = vmatprep.mubr.f32.mxu0 %v904_v1  ;;  %v290_v4 = vld [vmem:[#allocation5] sm:$0xff]  ;;  %v670_v5 = vpack.c.bf16 %v293_v3, %v291_v2  ;;  %v292_v6 = vld [vmem:[#allocation5 + $0x10] sm:$0xff]  ;;  %v295_v7 = vld [vmem:[#allocation5 + $0x28] sm:$0xff]  ;;  %s624_s6 = sshll.u32 %s607_s4, 1  ;;  %vm518_vm1 = vcmask 7168  }
  0x7e   : > { %v297_v8 = vld [vmem:[#allocation5 + $0x38] sm:$0xff]  ;;  %v672_v9 = vpack.c.bf16 %v292_v6, %v290_v4  ;;  %v294_v11 = vld [vmem:[#allocation5 + $0x20] sm:$0xff]  ;;  %v296_v12 = vld [vmem:[#allocation5 + $0x30] sm:$0xff]  ;;  %p283_p2 = scmp.lt.s32.totalorder %s624_s6, 3 }
  0x7f   : > { %v674_v10 = vpack.c.bf16 %v297_v8, %v295_v7  ;;  %671 = vmatprep.subr.bf16.mxu0 %v670_v5  ;;  %v418_v13 = vld [vmem:[#allocation7 + $0x80] sm:$0xff]  ;;  %v419_v14 = vld [vmem:[#allocation7 + $0x88] sm:$0xff]  ;;  %v676_v15 = vpack.c.bf16 %v296_v12, %v294_v11  ;;  %v420_v19 = vld [vmem:[#allocation7 + $0x90] sm:$0xff] }
  0x80   : > { %673 = vmatpush1.bf16.msra.mxu0 %v672_v9  ;;  %v678_v16 = vpack.c.bf16 %v419_v14, %v418_v13  ;;  %v402_v17 = vld [vmem:[#allocation7] sm:$0xff]  ;;  %v403_v18 = vld [vmem:[#allocation7 + $0x8] sm:$0xff]  ;;  %v421_v21 = vld [vmem:[#allocation7 + $0x98] sm:$0xff]  ;;  %s1161_s6 = smov (!%p283_p2, %s624_s6), 3 }
  0x81   : > { %675 = vmatprep.subr.bf16.mxu0 %v674_v10  ;;  %v680_v20 = vpack.c.bf16 %v403_v18, %v402_v17  ;;  %v404_v22 = vld [vmem:[#allocation7 + $0x10] sm:$0xff]  ;;  %v405_v23 = vld [vmem:[#allocation7 + $0x18] sm:$0xff]  ;;  %v682_v24 = vpack.c.bf16 %v421_v21, %v420_v19  ;;  %v422_v25 = vld [vmem:[#allocation7 + $0xa0] sm:$0xff]  ;;  %s625_s13 = sshll.u32 %s1161_s6, 3 }
  0x82   : > { %679 = vmatprep.subr.bf16.mxu1 %v678_v16  ;;  %v423_v26 = vld [vmem:[#allocation7 + $0xa8] sm:$0xff]  ;;  %v684_v27 = vpack.c.bf16 %v405_v23, %v404_v22  ;;  %v288_v28 = vld [vmem:[%s242_s20] sm:$0xff]  ;;  %v425_v33 = vld [vmem:[#allocation7 + $0xb8] sm:$0xff]  ;;  %s286_s8 = scalar_lea.vmem %s1140_s5, %s625_s13 }
  0x83   : > { %681 = vmatpush3.bf16.msra.mxu1 %v680_v20  ;;  %v686_v29 = vpack.c.bf16 %v423_v26, %v422_v25  ;;  %v406_v30 = vld [vmem:[#allocation7 + $0x20] sm:$0xff]  ;;  %v407_v31 = vld [vmem:[#allocation7 + $0x28] sm:$0xff]  ;;  %v424_v32 = vld [vmem:[#allocation7 + $0xb0] sm:$0xff] }
  0x84   : > { %677 = vmatpush1.bf16.msra.mxu0 %v676_v15  ;;  %683 = vmatprep.subr.bf16.mxu1 %v682_v24  ;;  %v688_v34 = vpack.c.bf16 %v407_v31, %v406_v30  ;;  %v289_v35 = vld [vmem:[%s242_s20 + $0x8] sm:$0xff]  ;;  %v690_v36 = vpack.c.bf16 %v425_v33, %v424_v32  ;;  %v408_v37 = vld [vmem:[#allocation7 + $0x30] sm:$0xff]  ;;  %v426_v39 = vld [vmem:[#allocation7 + $0xc0] sm:$0xff] }
  0x85   : > { %v409_v38 = vld [vmem:[#allocation7 + $0x38] sm:$0xff]  ;;  %v427_v40 = vld [vmem:[#allocation7 + $0xc8] sm:$0xff]  ;;  %v410_v43 = vld [vmem:[#allocation7 + $0x40] sm:$0xff] }
  0x86   : > { %v692_v41 = vpack.c.bf16 %v409_v38, %v408_v37  ;;  %v694_v42 = vpack.c.bf16 %v427_v40, %v426_v39  ;;  %v411_v44 = vld [vmem:[#allocation7 + $0x48] sm:$0xff]  ;;  %v428_v45 = vld [vmem:[#allocation7 + $0xd0] sm:$0xff]  ;;  %v429_v46 = vld [vmem:[#allocation7 + $0xd8] sm:$0xff] }
  0x87   : > { %626 = vmatmul.mubr.msk.f32.vlgmr.msra.gmra.mrb[0].mxu0 %vm310_vm0, %v288_v28  ;;  %685 = vmatpush3.bf16.msra.mxu1 %v684_v27  ;;  %v696_v47 = vpack.c.bf16 %v411_v44, %v410_v43  ;;  %v698_v48 = vpack.c.bf16 %v429_v46, %v428_v45  ;;  %v412_v49 = vld [vmem:[#allocation7 + $0x50] sm:$0xff]  ;;  %v413_v50 = vld [vmem:[#allocation7 + $0x58] sm:$0xff]  ;;  %v430_v52 = vld [vmem:[#allocation7 + $0xe0] sm:$0xff] }
  0x88   : > { %387 = vmatprep.mubr.f32.mxu0 %v904_v1  ;;  %687 = vmatprep.subr.bf16.mxu1 %v686_v29  ;;  %v700_v51 = vpack.c.bf16 %v413_v50, %v412_v49  ;;  %v431_v53 = vld [vmem:[#allocation7 + $0xe8] sm:$0xff]  ;;  %v414_v55 = vld [vmem:[#allocation7 + $0x60] sm:$0xff]  ;;  %v432_v58 = vld [vmem:[#allocation7 + $0xf0] sm:$0xff]  ;;  %v301_v1 = vshrl.u32 %v300_v0, 7 }
  0x89   : > { %v702_v54 = vpack.c.bf16 %v431_v53, %v430_v52  ;;  %v415_v56 = vld [vmem:[#allocation7 + $0x68] sm:$0xff]  ;;  %v433_v59 = vld [vmem:[#allocation7 + $0xf8] sm:$0xff]  ;;  %v416_v61 = vld [vmem:[#allocation7 + $0x70] sm:$0xff] }
  0x8a   : > { %v704_v57 = vpack.c.bf16 %v415_v56, %v414_v55  ;;  %v706_v60 = vpack.c.bf16 %v433_v59, %v432_v58  ;;  %v417_v62 = vld [vmem:[#allocation7 + $0x78] sm:$0xff]  ;;  %v302_v2 = vsub.s32 0, %v301_v1  ;;  %v306_v4 = vsub.s32 1, %v301_v1 }
  0x8b   : > { %627 = vmatmul.mubr.msk.f32.gmra.mrb[2].mxu0 %vm310_vm0, %v289_v35  ;;  %689 = vmatpush3.bf16.msra.mxu1 %v688_v34  ;;  %v708_v63 = vpack.c.bf16 %v417_v62, %v416_v61  ;;  %v298_v3 = vld [vmem:[%s1137_s2] sm:$0x3] }
  0x8c   : > { %691 = vmatprep.subr.bf16.mxu1 %v690_v36  ;;  %v303_v5 = vrot.slane %v298_v3, %v302_v2  ;;  %v307_v6 = vrot.slane %v298_v3, %v306_v4  ;;  %v628_v25 = vld [vmem:[#allocation2] ss:$0 sm:$0xff] }
  0x8f   : > { %693 = vmatpush3.bf16.msra.mxu1 %v692_v41 }
  0x90   : > { %695 = vmatprep.subr.bf16.mxu1 %v694_v42 }
  0x93   : > { %697 = vmatpush3.bf16.msra.mxu1 %v696_v47 }
  0x94   : > { %699 = vmatprep.subr.bf16.mxu1 %v698_v48 }
  0x97   : > { %701 = vmatpush3.bf16.msra.mxu1 %v700_v51 }
  0x98   : > { %703 = vmatprep.subr.bf16.mxu1 %v702_v54 }
  0x9b   : > { %705 = vmatpush3.bf16.msra.mxu1 %v704_v57 }
  0x9c   : > { %707 = vmatprep.subr.bf16.mxu1 %v706_v60 }
  0x9f   : > { %709 = vmatpush3.bf16.msra.mxu1 %v708_v63 }
 0x15a   : > { %v383_v7 = vpop.f32.mrb[0].mxu0 }
 0x15b   : > { %v384_v8 = vadd.f32 %v383_v7, %v303_v5  ;;  %v385_v9 = vpop.f32.mrb[1].mxu0 }
 0x15c   : > { %v386_v10 = vadd.f32 %v385_v9, %v307_v6 }
 0x15d   : > { %v394_v11 = vmul.f32 0.1, %v384_v8 }
 0x15e   : > { %v389_v12 = vpop.f32.mrb[2].mxu0  ;;  %v395_v13 = vmul.f32 0.1, %v386_v10 }
 0x15f   : > { %v390_v14 = vadd.f32 %v389_v12, %v303_v5  ;;  %v391_v15 = vpop.f32.mrb[3].mxu0  ;;  %v398_v18 = vmax.f32 %v384_v8, %v394_v11 }
 0x160   : > { %v392_v16 = vadd.f32 %v391_v15, %v307_v6  ;;  %v399_v17 = vmax.f32 %v386_v10, %v395_v13 }
 0x161   : > { %v396_v19 = vmul.f32 0.1, %v390_v14 }
 0x162   : > { %v397_v20 = vmul.f32 0.1, %v392_v16  ;;  %498 = vmatprep.mubr.f32.mxu1 %v399_v17 }
 0x163   : > { %499 = vmatmul.mubr.f32.vlgmr.msra.gmra.mrb[0].mxu1 %v398_v18  ;;  %v400_v22 = vmax.f32 %v390_v14, %v396_v19 }
 0x164   : > { %v401_v21 = vmax.f32 %v392_v16, %v397_v20 }
 0x166   : > { %503 = vmatprep.mubr.f32.mxu1 %v401_v21 }
 0x167   : > { %504 = vmatmul.mubr.f32.gmra.mrb[2].mxu1 %v400_v22 }
 0x236   : > { %v664_v23 = vpop.f32.mrb[0].mxu1 }
 0x237   : > { %v665_v24 = vpop.f32.mrb[1].mxu1 }
 0x238   : > { %v666_v26 = vadd.f32 %v665_v24, %v664_v23 }
 0x23a   : > { %v516_v27 = vadd.f32 %v666_v26, %v628_v25  ;;  %v667_v28 = vpop.f32.mrb[2].mxu1 }
 0x23b   : > { %v668_v29 = vpop.f32.mrb[3].mxu1 }
 0x23c   : > { %519 = vst.msk [vmem:[%s286_s8] sm:$0xff] %vm518_vm1, %v516_v27  ;;  %v669_v30 = vadd.f32 %v668_v29, %v667_v28 }
 0x23e   : > { %v517_v31 = vadd.f32 %v669_v30, %v628_v25 }
 0x240   : > { %520 = vst.msk [vmem:[%s286_s8 + $0x8] sm:$0xff] %vm518_vm1, %v517_v31 }
 0x241 PF: > { %p18_p3 = scmp.ge.s32.totalorder %s958_s24, 4   ;;  %s1154_s20 = smov %s885_s21 }
 0x242   : > { %s1155_s21 = smov %s889_s22  ;;  %s1156_s22 = smov %s968_s27 }
 0x243   : > { %s1157_s23 = smov %s958_s24  ;;  %20 = sbr.rel (!%p18_p3) target bundleno = 7 (0x7), region = 88 }
 0x24a   :  { %543 = vsyncpa [#allocation4], 1 }
 0x24b   :  { %545 = vsyncpa [#allocation4 + $0x1], 1 }
 0x24c   :  { %546 = vsyncpa [#allocation6], 1 }

</bundles_post_ra>
